<compile_context>
chip_gen: v7x
topology: tpu7x:2x2x1
jax: 0.10.0
libtpu: 0.0.40
codegen_flags: <defaults>
</compile_context>

<pallas_src>
import math

import jax
import jax.numpy as jnp
from jax.experimental import pallas as pl
from jax.experimental.pallas import tpu as pltpu

N_HEADS = 4
N_POINTS = 4


def _round_up(v, m):
    return (v + m - 1) // m * m


def _pick_token_tile(n):
    for t in (512, 256, 128, 64, 32, 16, 8):
        if n % t == 0:
            return t
    return n


def _pad_last(a, target):
    pad = target - a.shape[-1]
    if pad == 0:
        return a
    cfg = [(0, 0)] * (a.ndim - 1) + [(0, pad)]
    return jnp.pad(a, cfg)


def _pad2(w, rows, cols):
    return jnp.pad(w, ((0, rows - w.shape[0]), (0, cols - w.shape[1])))


# ----------------------------------------------------------------------------
# Kernel 1: fused [value | sampling-offset | attention-logit] projection.
#   cat = x @ [Wv | Wo | Wa] + [bv | bo | ba]      (single lane-dense matmul)
# ----------------------------------------------------------------------------
def _proj_kernel(x_ref, w_ref, b_ref, out_ref):
    acc = jnp.dot(x_ref[...], w_ref[...], preferred_element_type=jnp.float32)
    out_ref[...] = (acc + b_ref[...]).astype(out_ref.dtype)


# ----------------------------------------------------------------------------
# Kernel 2: output projection + residual 1 + MLP + residual 2.
#   attn_out = head_out @ Wout + bout
#   y1       = attn_out + x
#   out      = (GELU(y1 @ W1 + b1) @ W2 + b2) + y1
# ----------------------------------------------------------------------------
def _attn_mlp_kernel(ho_ref, x_ref, wout_ref, bout_ref,
                     w1_ref, b1_ref, w2_ref, b2_ref, out_ref):
    attn_out = jnp.dot(ho_ref[...], wout_ref[...],
                       preferred_element_type=jnp.float32) + bout_ref[...]
    y1 = attn_out + x_ref[...].astype(jnp.float32)           # residual 1
    h = jnp.dot(y1.astype(jnp.bfloat16), w1_ref[...],
                preferred_element_type=jnp.float32) + b1_ref[...]
    # TODO(synk): torch nn.GELU defaults to exact erf; tanh approximation is
    # used here for guaranteed Mosaic lowering.
    h = jax.nn.gelu(h, approximate=True)
    mlp = jnp.dot(h.astype(jnp.bfloat16), w2_ref[...],
                  preferred_element_type=jnp.float32) + b2_ref[...]
    out_ref[...] = (mlp + y1).astype(out_ref.dtype)           # residual 2


# ----------------------------------------------------------------------------
# XLA glue: reference points, fused trilinear gather + attention-weighted
# point sum (shared by the kernel path and the pure-JAX reference).
# ----------------------------------------------------------------------------
def _reference_points(S):
    idx = jnp.arange(S * S * S, dtype=jnp.int32)
    z = idx // (S * S)
    y = (idx // S) % S
    x = idx % S
    return jnp.stack([z, y, x], axis=-1).astype(jnp.float32)   # (N, 3)


def _fused_sample_aggregate(value_heads, pos, attn, S):
    """grid_sample-style trilinear interp (zero padding) fused with the
    attention-weighted sum over sampling points.

    value_heads: (B, H, N, hd)   N = S^3 in (z, y, x) raster order.
    pos        : (B, N, H, P, 3) continuous voxel coordinates (z, y, x).
    attn       : (B, N, H, P)    softmaxed per-point attention weights.
    returns    : (B, N, H*hd)    f32 head outputs (pre output_proj).
    """
    B, H, N, hd = value_heads.shape
    P = pos.shape[3]
    pz, py, px = pos[..., 0], pos[..., 1], pos[..., 2]
    z0, y0, x0 = jnp.floor(pz), jnp.floor(py), jnp.floor(px)
    fz, fy, fx = pz - z0, py - y0, px - x0
    vh = value_heads.astype(jnp.float32)
    out = jnp.zeros((B, H, N, hd), jnp.float32)
    for dz in (0, 1):
        for dy in (0, 1):
            for dx in (0, 1):
                zc, yc, xc = z0 + dz, y0 + dy, x0 + dx
                w = ((fz if dz else 1.0 - fz) * (fy if dy else 1.0 - fy)
                     * (fx if dx else 1.0 - fx))
                valid = ((zc >= 0) & (zc < S) & (yc >= 0) & (yc < S)
                         & (xc >= 0) & (xc < S)).astype(jnp.float32)
                zi = jnp.clip(zc, 0, S - 1).astype(jnp.int32)
                yi = jnp.clip(yc, 0, S - 1).astype(jnp.int32)
                xi = jnp.clip(xc, 0, S - 1).astype(jnp.int32)
                idx = (zi * S + yi) * S + xi                   # (B, N, H, P)
                cw = w * valid * attn                          # corner * attn
                idx_t = idx.transpose(0, 2, 1, 3).reshape(B, H, N * P)
                g = jnp.take_along_axis(vh, idx_t[..., None], axis=2)
                g = g.reshape(B, H, N, P, hd)
                cw_t = cw.transpose(0, 2, 1, 3)[..., None]     # (B,H,N,P,1)
                out = out + jnp.sum(g * cw_t, axis=3)          # (B,H,N,hd)
    return out.transpose(0, 2, 1, 3).reshape(B, N, H * hd)


# ----------------------------------------------------------------------------
# Forward pass (Pallas path)
# ----------------------------------------------------------------------------
def encoder_block_forward(x, params, S):
    B, N, C = x.shape
    H, P = N_HEADS, N_POINTS
    hd = C // H
    OFF, AW = H * P * 3, H * P

    f32, bf16 = jnp.float32, jnp.bfloat16
    Cp = _round_up(C, 128)                 # lane-dense channel dim
    OUTp = _round_up(C + OFF + AW, 128)    # lane-dense fused projection width
    HIDp = _round_up(4 * C, 128)           # lane-dense MLP hidden dim
    TN = _pick_token_tile(N)               # token tile (pipelining / VMEM)
    NT = N // TN

    # --- padded, bf16 parameters (zero-padding is exact: adds nothing) -------
    w_cat = _pad2(jnp.concatenate(
        [params["wv"], params["wo"], params["wa"]], axis=1), Cp, OUTp).astype(bf16)
    b_cat = _pad_last(jnp.concatenate(
        [params["bv"], params["bo"], params["ba"]], axis=1), OUTp).astype(f32)
    wout = _pad2(params["wout"], Cp, Cp).astype(bf16)
    bout = _pad_last(params["bout"], Cp).astype(f32)
    w1 = _pad2(params["w1"], Cp, HIDp).astype(bf16)
    b1 = _pad_last(params["b1"], HIDp).astype(f32)
    w2 = _pad2(params["w2"], HIDp, Cp).astype(bf16)
    b2 = _pad_last(params["b2"], Cp).astype(f32)

    xb = _pad_last(x.astype(bf16), Cp)                         # (B, N, Cp)

    def tok(last):
        return pl.BlockSpec((None, TN, last), lambda b, t: (b, t, 0))

    def rep(shape):                       # grid-invariant (weights / biases)
        nd = len(shape)
        return pl.BlockSpec(shape, lambda b, t, _nd=nd: (0,) * _nd)

    cparams = pltpu.CompilerParams(
        dimension_semantics=("parallel", "parallel"),
        vmem_limit_bytes=48 * 1024 * 1024)

    # ---- kernel 1: fused projections ----------------------------------------
    cat = pl.pallas_call(
        _proj_kernel,
        out_shape=jax.ShapeDtypeStruct((B, N, OUTp), bf16),
        grid=(B, NT),
        in_specs=[tok(Cp), rep((Cp, OUTp)), rep((1, OUTp))],
        out_specs=tok(OUTp),
        compiler_params=cparams,
    )(xb, w_cat, b_cat)

    # ---- glue: point softmax + fused trilinear gather / point aggregation ---
    # TODO(synk): the data-dependent trilinear grid_sample gather stays in XLA
    # glue; for large volumes it should become a third Pallas kernel with
    # scalar-prefetched corner indices / manual DMA gather.
    val = cat[..., :C]                                         # bf16 (B, N, C)
    off = cat[..., C:C + OFF].astype(f32).reshape(B, N, H, P, 3)
    logits = cat[..., C + OFF:C + OFF + AW].astype(f32).reshape(B, N, H, P)
    attn = jax.nn.softmax(logits, axis=-1)
    pos = _reference_points(S)[None, :, None, None, :] + off
    value_heads = val.reshape(B, N, H, hd).transpose(0, 2, 1, 3)
    head_out = _fused_sample_aggregate(value_heads, pos, attn, S)   # f32 (B,N,C)
    hob = _pad_last(head_out.astype(bf16), Cp)                 # (B, N, Cp)

    # ---- kernel 2: out-proj + residual 1 + MLP + residual 2 ------------------
    out = pl.pallas_call(
        _attn_mlp_kernel,
        out_shape=jax.ShapeDtypeStruct((B, N, Cp), f32),
        grid=(B, NT),
        in_specs=[tok(Cp), tok(Cp),
                  rep((Cp, Cp)), rep((1, Cp)),
                  rep((Cp, HIDp)), rep((1, HIDp)),
                  rep((HIDp, Cp)), rep((1, Cp))],
        out_specs=tok(Cp),
        compiler_params=cparams,
    )(hob, xb, wout, bout, w1, b1, w2, b2)
    return out[..., :C]


# ----------------------------------------------------------------------------
# Pure-JAX reference of the same numerical recipe (verifies the kernels)
# ----------------------------------------------------------------------------
def reference_forward(x, params, S):
    B, N, C = x.shape
    H, P = N_HEADS, N_POINTS
    hd = C // H
    OFF, AW = H * P * 3, H * P
    f32, bf16 = jnp.float32, jnp.bfloat16

    def mm(a, w):
        return jnp.dot(a.astype(bf16), w.astype(bf16),
                       preferred_element_type=f32)

    xb = x.astype(bf16)
    cat = jnp.concatenate(
        [mm(xb, params["wv"]) + params["bv"],
         mm(xb, params["wo"]) + params["bo"],
         mm(xb, params["wa"]) + params["ba"]], axis=-1).astype(bf16)
    val = cat[..., :C]
    off = cat[..., C:C + OFF].astype(f32).reshape(B, N, H, P, 3)
    logits = cat[..., C + OFF:].astype(f32).reshape(B, N, H, P)
    attn = jax.nn.softmax(logits, axis=-1)
    pos = _reference_points(S)[None, :, None, None, :] + off
    value_heads = val.reshape(B, N, H, hd).transpose(0, 2, 1, 3)
    head_out = _fused_sample_aggregate(value_heads, pos, attn, S)

    attn_out = mm(head_out.astype(bf16), params["wout"]) + params["bout"]
    y1 = attn_out + xb.astype(f32)                             # residual 1
    h = jax.nn.gelu(mm(y1, params["w1"]) + params["b1"], approximate=True)
    mlp = mm(h, params["w2"]) + params["b2"]
    return mlp + y1                                            # residual 2


def init_params(key, C):
    H, P = N_HEADS, N_POINTS
    keys = jax.random.split(key, 7)

    def lin(k, fan_in, fan_out, scale=None):
        s = scale if scale is not None else 1.0 / math.sqrt(fan_in)
        return jax.random.normal(k, (fan_in, fan_out), jnp.float32) * s

    return {
        "wv": lin(keys[0], C, C),
        "bv": jnp.zeros((1, C), jnp.float32),
        "wo": lin(keys[1], C, H * P * 3, scale=0.02),
        "bo": jax.random.normal(keys[2], (1, H * P * 3), jnp.float32) * 0.5,
        "wa": lin(keys[3], C, H * P),
        "ba": jnp.zeros((1, H * P), jnp.float32),
        "wout": lin(keys[4], C, C),
        "bout": jnp.zeros((1, C), jnp.float32),
        "w1": lin(keys[5], C, 4 * C),
        "b1": jnp.zeros((1, 4 * C), jnp.float32),
        "w2": lin(keys[6], 4 * C, C),
        "b2": jnp.zeros((1, C), jnp.float32),
    }


if __name__ == "__main__":
    key = jax.random.PRNGKey(0)
    kx, kp = jax.random.split(key)

    B, S, C = 2, 4, 32          # batch=2, 4x4x4 volume -> N=64 tokens, n_dim=32
    N = S * S * S
    x = jax.random.normal(kx, (B, N, C), jnp.float32)
    params = init_params(kp, C)

    out = encoder_block_forward(x, params, S)
    out = jax.block_until_ready(out)

    ref = reference_forward(x, params, S)
    assert out.shape == (B, N, C), out.shape
    err = float(jnp.max(jnp.abs(out - ref)))
    assert err < 5e-2, f"max abs err {err}"
    print("KERNEL_OK")
</pallas_src>

<mosaic_0001>
module attributes {stable_mosaic.version = 11 : i64} {
  func.func @_proj_kernel(%arg0: i32, %arg1: i32, %arg2: memref<1x64x128xbf16, #tpu.memory_space<vmem>>, %arg3: memref<128x128xbf16, #tpu.memory_space<vmem>>, %arg4: memref<1x128xf32, #tpu.memory_space<vmem>>, %arg5: memref<1x64x128xbf16, #tpu.memory_space<vmem>>) attributes {dimension_semantics = [#tpu.dimension_semantics<parallel>, #tpu.dimension_semantics<parallel>], iteration_bounds = array<i64: 2, 1>, scalar_prefetch = 0 : i64, scratch_operands = 0 : i64, tpu.core_type = #tpu.core_type<tc>, window_params = [{transform_indices = @transform_0, window_bounds = array<i64: 1, 64, 128>}, {pipeline_mode = #tpu.pipeline_mode<synchronous>, transform_indices = @transform_1, window_bounds = array<i64: 128, 128>}, {pipeline_mode = #tpu.pipeline_mode<synchronous>, transform_indices = @transform_2, window_bounds = array<i64: 1, 128>}, {transform_indices = @transform_3, window_bounds = array<i64: 1, 64, 128>}]} {
    %c0 = arith.constant 0 : index
    %c0_0 = arith.constant 0 : index
    %c0_1 = arith.constant 0 : index
    %0 = vector.load %arg2[%c0, %c0_0, %c0_1] : memref<1x64x128xbf16, #tpu.memory_space<vmem>>, vector<1x64x128xbf16>
    %1 = vector.shape_cast %0 : vector<1x64x128xbf16> to vector<64x128xbf16>
    %c0_2 = arith.constant 0 : index
    %c0_3 = arith.constant 0 : index
    %2 = vector.load %arg3[%c0_2, %c0_3] : memref<128x128xbf16, #tpu.memory_space<vmem>>, vector<128x128xbf16>
    %cst = arith.constant dense<0.000000e+00> : vector<64x128xf32>
    %3 = tpu.matmul %1, %2, %cst {dimension_numbers = #tpu.dot_dimension_numbers<[1], [0], [0], [1], [0, 0, 1, 1], [], []>} : vector<64x128xbf16>, vector<128x128xbf16>, vector<64x128xf32> -> vector<64x128xf32>
    %c0_4 = arith.constant 0 : index
    %c0_5 = arith.constant 0 : index
    %4 = vector.load %arg4[%c0_4, %c0_5] : memref<1x128xf32, #tpu.memory_space<vmem>>, vector<1x128xf32>
    %5 = vector.broadcast %4 : vector<1x128xf32> to vector<64x128xf32>
    %6 = arith.addf %3, %5 : vector<64x128xf32>
    %7 = arith.truncf %6 : vector<64x128xf32> to vector<64x128xbf16>
    %c0_6 = arith.constant 0 : index
    %c0_7 = arith.constant 0 : index
    %c0_8 = arith.constant 0 : index
    %8 = vector.load %arg5[%c0_6, %c0_7, %c0_8] : memref<1x64x128xbf16, #tpu.memory_space<vmem>>, vector<1x64x128xbf16>
    %9 = vector.shape_cast %8 : vector<1x64x128xbf16> to vector<64x128xbf16>
    %10 = vector.shape_cast %7 : vector<64x128xbf16> to vector<1x64x128xbf16>
    tpu.vector_store %arg5[%c0_6, %c0_7, %c0_8], %10 {strides = array<i32>} : memref<1x64x128xbf16, #tpu.memory_space<vmem>>, vector<1x64x128xbf16>,
    return
  }
  func.func @transform_0(%arg0: i32, %arg1: i32) -> (i32, i32, i32) {
    %c0_i32 = arith.constant 0 : i32
    %c0_i32_0 = arith.constant 0 : i32
    return %arg0, %arg1, %c0_i32 : i32, i32, i32
  }
  func.func @transform_1(%arg0: i32, %arg1: i32) -> (i32, i32) {
    %c0_i32 = arith.constant 0 : i32
    %c0_i32_0 = arith.constant 0 : i32
    %c0_i32_1 = arith.constant 0 : i32
    return %c0_i32, %c0_i32_0 : i32, i32
  }
  func.func @transform_2(%arg0: i32, %arg1: i32) -> (i32, i32) {
    %c0_i32 = arith.constant 0 : i32
    %c0_i32_0 = arith.constant 0 : i32
    %c0_i32_1 = arith.constant 0 : i32
    return %c0_i32, %c0_i32_0 : i32, i32
  }
  func.func @transform_3(%arg0: i32, %arg1: i32) -> (i32, i32, i32) {
    %c0_i32 = arith.constant 0 : i32
    %c0_i32_0 = arith.constant 0 : i32
    return %arg0, %arg1, %c0_i32 : i32, i32, i32
  }
}

</mosaic_0001>

<bundles_post_ra>
// kernel: tpu_custom_call.1
= control target key start
LH: loop header
LB: loop body
LE: loop exit
PB: predicated region body
PF: predicated region fallthrough
CT: control target
= control target key end

     0   :  { %8 = vsyncpa [#allocation3], 0  ;;  %s1169_s0 = inlined_call_operand.hbm [shape: bf16[2,64,128], index: 0, kind: input, shape index: {}]   ;;  %s1170_s1 = inlined_call_operand.hbm [shape: bf16[128,128], index: 1, kind: input, shape index: {}]   ;;  %s1171_s2 = inlined_call_operand.vmem [shape: f32[1,128], index: 2, kind: input, shape index: {}]   ;;  %s1172_s3 = inlined_call_operand.hbm [shape: bf16[2,64,128], index: 3, kind: output, shape index: {}]  }
   0x1   :  { %10 = vsyncpa [#allocation3 + $0x1], 0 }
   0x2   :  { %11 = vsyncpa [#allocation6], 0 }
   0x3   :  { %12 = vsyncpa [#allocation4], 0 }
   0x4   :  { %14 = vsyncpa [#allocation4 + $0x1], 0  ;;  %s931_s12 = smov 0   ;;  %s933_s13 = smov 0  }
   0x5   :  { %s935_s14 = smov 0   ;;  %s937_s15 = smov 0  }
   0x6   :  { %s939_s16 = smov 0   ;;  %s941_s17 = smov 0  }
   0x7 LB: > { %s546_s18 = sadd.s32 4294967295, %s902_s17   ;;  %s547_s19 = sadd.s32 4294967294, %s902_s17   ;;  %s902_s17 = sphi %s941_s17, %s20_s17   ;;  %s898_s16 = sphi %s939_s16, %s1196_s16   ;;  %s894_s15 = sphi %s937_s15, %s1195_s15   ;;  %s890_s14 = sphi %s935_s14, %s1194_s14   ;;  %s886_s13 = sphi %s933_s13, %s1193_s13   ;;  %s882_s12 = sphi %s931_s12, %s1192_s12  }
   0x8   : > { %p54_p0 = scmp.ne.s32.totalorder %s886_s13, %s882_s12  ;;  %p965_p1 = scmp.eq.s32.totalorder %s546_s18, 0 }
   0x9   : > { %p969_p2 = scmp.eq.s32.totalorder %s546_s18, 1  ;;  %p128_p3 = scmp.eq.s32.totalorder %s547_s19, 1 }
   0xa   : > { %s1177_s20 = scalar_select %p965_p1, 1, 0 }
   0xb   : > { %s1178_s21 = scalar_select %p969_p2, 1, 0 }
   0xc   : > { %p975_p4 = por %p965_p1, %p54_p0  ;;  %p548_p5 = scmp.ge.s32.totalorder %s902_s17, 1 }
   0xd   : > { %p980_p6 = por %p128_p3, %p54_p0  ;;  %p135_p7 = scmp.lt.s32.totalorder %s902_s17, 3 }
   0xe   : > { %s1179_s22 = scalar_select %p975_p4, 1, 0 }
   0xf   : > { %s1180_s23 = scalar_select %p980_p6, 1, 0 }
  0x10   : > { %p985_p8 = pnand %p548_p5, %p135_p7  ;;  %s904_s25 = smov [#allocation5]  }
  0x11   : > { %s147_s26 = sshll.u32 %s904_s25, 4  ;;  %s32_s28 = sadd.s32 1, %s898_s16  ;;  %s148_s26 = int_to_ptr.vmem [resolvable:$true] %s147_s26 }
  0x12   : > { %s1181_s24 = scalar_select %p985_p8, 1, 0 }
  0x13   : > { %p677_p9 = pneg %p985_p8  ;;  %s758_s4 = scalar_lea.hbm %s1170_s1, 1024 }
  0x14   : > { %p759_p12 = scmp.ne.s32.totalorder %s1170_s1, %s758_s4  ;;  %p765_p5 = scmp.lt.u32.totalorder %s758_s4, %s1170_s1 }
  0x15   : > { %p994_p11 = pnand %p677_p9, %p965_p1 }
  0x17   : > { %p760_p13 = pneg %p994_p11 }
  0x19   : > { %p761_p0 = pnand %p760_p13, %p759_p12 }
  0x1b   : > { %p762_p3 = pneg %p761_p0 }
  0x1d   : > { %p767_p7 = pnand %p765_p5, %p762_p3 }
  0x1f   : > { %770 = shalt.err (!%p767_p7)
}
  0x20   : > { %s771_s9 = scalar_lea.vmem %s148_s26, 1024  ;;  %p779_p1 = scmp.lt.s32.totalorder %s148_s26, %s148_s26 }
  0x21   : > { %p772_p9 = scmp.ne.s32.totalorder %s148_s26, %s771_s9  ;;  %p780_p4 = scmp.lt.s32.totalorder %s771_s9, %s771_s9 }
  0x23   : > { %p774_p10 = pnand %p772_p9, %p760_p13  ;;  %p781_p8 = por %p780_p4, %p779_p1 }
  0x25   : > { %p775_p6 = pneg %p774_p10 }
  0x27   : > { %p782_p2 = pnand %p781_p8, %p775_p6 }
  0x29   : > { %785 = shalt.err (!%p782_p2)
}
  0x2a   : > { %s905_s10 = smov 64   ;;  %s906_s11 = smov 4  }
  0x2b   : > { %680 = dma.hbm_to_vmem [thread:$0]  (!%p994_p11), %s1170_s1, 1024, %s148_s26, [#allocation6], %s905_s10, %s905_s10, %s906_s11  }
  0x2c   : > { %p34_p1 = scmp.ge.s32.totalorder %s32_s28, 2  ;;  %s41_s25 = sadd.s32 1, %s890_s14 }
  0x2d   : > { %p48_p2 = scmp.ne.s32.totalorder %s890_s14, %s886_s13  ;;  %p49_p4 = scmp.eq.s32.totalorder %s902_s17, 0 }
  0x2e   : > { %s1198_s28 = smov (%p34_p1, %s32_s28), 0  ;;  %p1184_p8 = scmp.ne.s32.totalorder %s1178_s21, 0 }
  0x2f   : > { %p1024_p6 = por %p49_p4, %p48_p2  ;;  %s36_s30 = ssub.s32 %s898_s16, %s1198_s28 }
  0x30   : > { %p1030_p10 = por %p1184_p8, %p48_p2  ;;  %p690_p12 = scmp.lt.s32.totalorder %s902_s17, 2 }
  0x31   : > { %p39_p11 = scmp.eq.s32.totalorder %s36_s30, 0  ;;  %s164_s26 = sand.u32 1, %s890_s14  }
  0x32   : > { %s551_s4 = sshll.u32 %s164_s26, 5  ;;  %s584_s6 = sshll.u32 %s898_s16, 9 }
  0x33   : > { %s1039_s5 = scalar_select %p39_p11, %s890_s14, %s41_s25  }
  0x34   : > { %s1045_s9 = scalar_lea.hbm %s1169_s0, %s584_s6  ;;  %s168_s21 = scalar_lea.vmem [#allocation2], %s551_s4 }
  0x35   : > { %s177_s18 = sshll.u32 %s168_s21, 4  ;;  %p1051_p13 = pnand %p690_p12, %p1024_p6  ;;  %s1047_s18 = int_to_ptr.vmem [resolvable:$true] %s177_s18 }
  0x36   : > { %s1055_s25 = scalar_lea.sflag [#allocation3], %s164_s26  ;;  %s786_s30 = scalar_lea.hbm %s1045_s9, 512 }
  0x37   : > { %p787_p0 = scmp.ne.s32.totalorder %s1045_s9, %s786_s30  ;;  %p788_p3 = pneg %p1051_p13 }
  0x38   : > { %s791_s29 = scalar_lea.hbm %s1169_s0, 1024  ;;  %p792_p9 = scmp.lt.u32.totalorder %s1045_s9, %s1169_s0 }
  0x39   : > { %p789_p5 = pnand %p788_p3, %p787_p0  ;;  %p793_p1 = scmp.lt.u32.totalorder %s791_s29, %s786_s30 }
  0x3a   : > { %p795_p4 = scmp.lt.u32.totalorder %s786_s30, %s1045_s9 }
  0x3b   : > { %p790_p7 = pneg %p789_p5  ;;  %p794_p2 = por %p793_p1, %p792_p9 }
  0x3d   : > { %p796_p6 = por %p795_p4, %p794_p2 }
  0x3f   : > { %p797_p8 = pnand %p796_p6, %p790_p7 }
  0x41   : > { %800 = shalt.err (!%p797_p8)
}
  0x42   : > { %s801_s26 = scalar_lea.vmem %s1047_s18, 512  ;;  %s907_s21 = smov [#allocation2]  }
  0x43   : > { %p802_p12 = scmp.ne.s32.totalorder %s1047_s18, %s801_s26  ;;  %s806_s4 = sshll.u32 %s907_s21, 4  ;;  %s807_s4 = int_to_ptr.vmem [resolvable:$false] %s806_s4 }
  0x44   : > { %s808_s6 = scalar_lea.vmem %s807_s4, 1024  ;;  %p809_p5 = scmp.lt.s32.totalorder %s1047_s18, %s807_s4 }
  0x45   : > { %p804_p11 = pnand %p802_p12, %p788_p3  ;;  %p810_p9 = scmp.lt.s32.totalorder %s808_s6, %s801_s26 }
  0x47   : > { %p805_p0 = pneg %p804_p11  ;;  %p811_p1 = por %p810_p9, %p809_p5 }
  0x49   : > { %p812_p2 = pnand %p811_p1, %p805_p0 }
  0x4b   : > { %815 = shalt.err (!%p812_p2)
}
  0x4c   : > { %684 = dma.hbm_to_vmem [thread:$0]  (!%p1051_p13), %s1045_s9, 512, %s1047_s18, %s1055_s25, %s905_s10, %s905_s10, %s906_s11  }
  0x4d   : > { %p1187_p3 = scmp.ne.s32.totalorder %s1181_s24, 0 }
  0x4e   : > { %s1089_s30 = sand.u32 (!%p1187_p3), 1, %s886_s13   ;;  %p1188_p7 = scmp.ne.s32.totalorder (!%p1187_p3), %s1179_s22, 0 }
  0x4f   : > { %189 = sbr.rel (%p1187_p3) target bundleno = 357 (0x165), region = 32  ;;  %s555_s29 = sshll.u32 (!%p1187_p3), %s1089_s30, 5 }
  0x50   : > { %s192_s7 = scalar_lea.sflag (!%p1187_p3), [#allocation3], %s1089_s30  ;;  %s1095_s19 = scalar_lea.vmem (!%p1187_p3), [#allocation2], %s555_s29 }
  0x56   : > { %869 = dma.done.wait (%p1188_p7), %s192_s7, 512  }
  0x57   : > { %871 = vsyncadd (%p1188_p7), %s192_s7, 4294966784  ;;  %p1189_p13 = scmp.ne.s32.totalorder %s1177_s20, 0 }
  0x59   : > { %873 = dma.done.wait (%p1189_p13), [#allocation6], 1024  }
  0x5a   : > { %875 = vsyncadd (%p1189_p13), [#allocation6], 4294966272  ;;  %v746_v0 = vld [vmem:[#allocation5] sm:$0xff]   ;;  %v747_v1 = vld [vmem:[#allocation5 + $0x8] sm:$0xff]   ;;  %s221_s24 = scalar_lea.vmem [#allocation7], %s555_s29  ;;  %s593_s11 = sshll.u32 %s894_s15, 9 }
  0x5b   : > { %629 = vmatprep.subr.bf16.mxu0 %v746_v0  ;;  %653 = vmatprep.subr.bf16.mxu1 %v746_v0  ;;  %v748_v2 = vld [vmem:[#allocation5 + $0x10] sm:$0xff]   ;;  %v749_v3 = vld [vmem:[#allocation5 + $0x18] sm:$0xff]   ;;  %v754_v4 = vld [vmem:[%s1095_s19] sm:$0xff]   ;;  %s449_s10 = sshll.u32 %s221_s24, 4  ;;  %s1120_s18 = scalar_lea.hbm %s1172_s3, %s593_s11  ;;  %s1115_s10 = int_to_ptr.vmem [resolvable:$true] %s449_s10 }
  0x5c   : > { %630 = vmatpush3.bf16.msra.mxu0 %v746_v0  ;;  %661 = vmatpush3.bf16.msra.mxu1 %v746_v0  ;;  %v755_v5 = vld [vmem:[%s1095_s19 + $0x10] sm:$0xff]   ;;  %v750_v6 = vld [vmem:[#allocation5 + $0x20] sm:$0xff]   ;;  %v751_v7 = vld [vmem:[#allocation5 + $0x28] sm:$0xff]   ;;  %s434_s25 = scalar_lea.sflag [#allocation4], %s1089_s30  ;;  %s816_s8 = scalar_lea.vmem %s1115_s10, 512 }
  0x5d   : > { %631 = vmatprep.subr.bf16.mxu0 %v747_v1  ;;  %654 = vmatprep.subr.bf16.mxu1 %v747_v1  ;;  %v752_v8 = vld [vmem:[#allocation5 + $0x30] sm:$0xff]   ;;  %v753_v9 = vld [vmem:[#allocation5 + $0x38] sm:$0xff]   ;;  %v756_v10 = vld [vmem:[%s1095_s19 + $0x8] sm:$0xff]   ;;  %p817_p4 = scmp.ne.s32.totalorder %s1115_s10, %s816_s8  ;;  %s908_s26 = smov [#allocation7]  }
  0x5e   : > { %645 = vmatprep.mubr.bf16.mxu0 %v754_v4  ;;  %649 = vmatprep.mubr.bf16.mxu1 %v755_v5  ;;  %v757_v11 = vld [vmem:[%s1095_s19 + $0x18] sm:$0xff]   ;;  %v558_v13 = vld [vmem:[%s1171_s2] ss:$0 sm:$0xff]  ;;  %s820_s21 = sshll.u32 %s908_s26, 4  ;;  %s821_s21 = int_to_ptr.vmem [resolvable:$false] %s820_s21 }
  0x5f   : > { %p818_p6 = pnand %p817_p4, %p1030_p10  ;;  %s822_s4 = scalar_lea.vmem %s821_s21, 1024 }
  0x60   : > { %632 = vmatpush3.bf16.msra.mxu0 %v747_v1  ;;  %662 = vmatpush3.bf16.msra.mxu1 %v747_v1  ;;  %p823_p12 = scmp.lt.s32.totalorder %s1115_s10, %s821_s21  ;;  %p824_p11 = scmp.lt.s32.totalorder %s822_s4, %s816_s8 }
  0x61   : > { %633 = vmatprep.subr.bf16.mxu0 %v748_v2  ;;  %655 = vmatprep.subr.bf16.mxu1 %v748_v2  ;;  %p819_p8 = pneg %p818_p6 }
  0x62   : > { %p825_p0 = por %p824_p11, %p823_p12 }
  0x64   : > { %634 = vmatpush3.bf16.msra.mxu0 %v748_v2  ;;  %663 = vmatpush3.bf16.msra.mxu1 %v748_v2  ;;  %p826_p5 = pnand %p825_p0, %p819_p8 }
  0x65   : > { %635 = vmatprep.subr.bf16.mxu0 %v749_v3  ;;  %656 = vmatprep.subr.bf16.mxu1 %v749_v3 }
  0x68   : > { %636 = vmatpush3.bf16.msra.mxu0 %v749_v3  ;;  %664 = vmatpush3.bf16.msra.mxu1 %v749_v3 }
  0x69   : > { %637 = vmatprep.subr.bf16.mxu0 %v750_v6  ;;  %657 = vmatprep.subr.bf16.mxu1 %v750_v6 }
  0x6c   : > { %638 = vmatpush3.bf16.msra.mxu0 %v750_v6  ;;  %665 = vmatpush3.bf16.msra.mxu1 %v750_v6 }
  0x6d   : > { %639 = vmatprep.subr.bf16.mxu0 %v751_v7  ;;  %658 = vmatprep.subr.bf16.mxu1 %v751_v7 }
  0x70   : > { %640 = vmatpush3.bf16.msra.mxu0 %v751_v7  ;;  %666 = vmatpush3.bf16.msra.mxu1 %v751_v7 }
  0x71   : > { %641 = vmatprep.subr.bf16.mxu0 %v752_v8  ;;  %659 = vmatprep.subr.bf16.mxu1 %v752_v8 }
  0x74   : > { %642 = vmatpush3.bf16.msra.mxu0 %v752_v8  ;;  %667 = vmatpush3.bf16.msra.mxu1 %v752_v8 }
  0x75   : > { %643 = vmatprep.subr.bf16.mxu0 %v753_v9  ;;  %660 = vmatprep.subr.bf16.mxu1 %v753_v9 }
  0x78   : > { %644 = vmatpush3.bf16.msra.mxu0 %v753_v9  ;;  %668 = vmatpush3.bf16.msra.mxu1 %v753_v9 }
  0x7b   : > { %646 = vmatmul.mubr.bf16.vlgmr.msra.gmra.mrb[0].mxu0 %v756_v10  ;;  %650 = vmatmul.mubr.bf16.vlgmr.msra.gmra.mrb[0].mxu1 %v757_v11 }
 0x14e   : > { %v647_v12 = vpop.f32.mrb[0].mxu0  ;;  %v651_v14 = vpop.f32.mrb[0].mxu1 }
 0x14f   : > { %v362_v15 = vpop.f32.mrb[1].mxu0  ;;  %v378_v16 = vpop.f32.mrb[1].mxu1  ;;  %v371_v19 = vadd.f32 %v647_v12, %v558_v13  ;;  %v387_v20 = vadd.f32 %v651_v14, %v558_v13 }
 0x150   : > { %v648_v17 = vpop.f32.mrb[2].mxu0  ;;  %v652_v18 = vpop.f32.mrb[2].mxu1  ;;  %v363_v25 = vadd.f32 %v558_v13, %v362_v15  ;;  %v379_v26 = vadd.f32 %v558_v13, %v378_v16 }
 0x151   : > { %v374_v21 = vadd.f32 %v648_v17, %v558_v13  ;;  %v390_v22 = vadd.f32 %v652_v18, %v558_v13  ;;  %v365_v23 = vpop.f32.mrb[3].mxu0  ;;  %v381_v24 = vpop.f32.mrb[3].mxu1 }
 0x152   : > { %v366_v27 = vadd.f32 %v558_v13, %v365_v23  ;;  %v382_v28 = vadd.f32 %v558_v13, %v381_v24 }
 0x153   : > { %v602_v29 = vpack.c.bf16 %v374_v21, %v371_v19  ;;  %v612_v30 = vpack.c.bf16 %v390_v22, %v387_v20 }
 0x154   : > { %v597_v31 = vpack.c.bf16 %v366_v27, %v363_v25  ;;  %v607_v32 = vpack.c.bf16 %v382_v28, %v379_v26 }
 0x155   : > { %614 = vst [vmem:[%s221_s24 + $0x8] sm:$0xff] %v602_v29   ;;  %616 = vst [vmem:[%s221_s24 + $0x18] sm:$0xff] %v612_v30  }
 0x156   : > { %598 = vst [vmem:[%s221_s24] sm:$0xff] %v597_v31   ;;  %615 = vst [vmem:[%s221_s24 + $0x10] sm:$0xff] %v607_v32  }
 0x157   : > { %829 = shalt.err (!%p826_p5)
}
 0x158   : > { %s830_s6 = scalar_lea.hbm %s1120_s18, 512  ;;  %s834_s19 = scalar_lea.hbm %s1172_s3, 1024 }
 0x159   : > { %p831_p9 = scmp.ne.s32.totalorder %s1120_s18, %s830_s6  ;;  %p835_p3 = scmp.lt.u32.totalorder %s1120_s18, %s1172_s3 }
 0x15a   : > { %p836_p7 = scmp.lt.u32.totalorder %s834_s19, %s830_s6  ;;  %p838_p4 = scmp.lt.u32.totalorder %s830_s6, %s1120_s18 }
 0x15b   : > { %p832_p1 = pnand %p831_p9, %p1030_p10 }
 0x15c   : > { %p837_p13 = por %p836_p7, %p835_p3 }
 0x15d   : > { %p833_p2 = pneg %p832_p1 }
 0x15e   : > { %p839_p6 = por %p838_p4, %p837_p13 }
 0x160   : > { %p840_p8 = pnand %p839_p6, %p833_p2 }
 0x162   : > { %843 = shalt.err (!%p840_p8)
}
 0x163   : > { %s909_s24 = smov 64   ;;  %s910_s11 = smov 4  }
 0x164   : > { %675 = dma.vmem_to_hbm [thread:$0]  (%p1030_p10), %s1115_s10, 512, %s1120_s18, %s434_s25, %s909_s24, %s909_s24, %s910_s11  }
 0x165 PF: > { %s464_s9 = sand.u32 1, %s882_s12   ;;  %p1190_p12 = scmp.ne.s32.totalorder %s1180_s23, 0 }
 0x166   : > { %p1191_p11 = scmp.ge.s32.totalorder %s902_s17, 2  ;;  %s465_s15 = scalar_lea.sflag [#allocation4], %s464_s9 }
 0x168   : > { %p686_p0 = pnand %p1191_p11, %p1190_p12 }
 0x16a   : > { %877 = dma.done.wait (!%p686_p0), %s465_s15, 512  }
 0x16b   : > { %879 = vsyncadd (!%p686_p0), %s465_s15, 4294966784  ;;  %s20_s17 = sadd.s32 1, %s902_s17   ;;  %s1192_s12 = smov %s886_s13 }
 0x16c   : > { %p17_p5 = scmp.ge.s32.totalorder %s20_s17, 4   ;;  %s1193_s13 = smov %s890_s14 }
 0x16d   : > { %s1194_s14 = smov %s1039_s5  ;;  %s1195_s15 = smov %s898_s16 }
 0x16e   : > { %s1196_s16 = smov %s1198_s28  ;;  %19 = sbr.rel (!%p17_p5) target bundleno = 7 (0x7), region = 81 }
 0x175   :  { %470 = vsyncpa [#allocation3], 1 }
 0x176   :  { %472 = vsyncpa [#allocation3 + $0x1], 1 }
 0x177   :  { %473 = vsyncpa [#allocation6], 1 }
 0x178   :  { %474 = vsyncpa [#allocation4], 1 }
 0x179   :  { %476 = vsyncpa [#allocation4 + $0x1], 1 }

</bundles_post_ra>
